<compile_context>
chip_gen: v6e
topology: v6e:2x2x1
jax: 0.10.0
libtpu: 0.0.40
codegen_flags: <defaults>
</compile_context>

<pallas_src>
import math

import jax
import jax.numpy as jnp
from jax.experimental import pallas as pl
from jax.experimental.pallas import tpu as pltpu


def make_sinusoidal_table(max_len, d_model, dtype=jnp.float32):
    """Exact JAX replica of the PyTorch buffer construction (d_model even)."""
    position = jnp.arange(max_len, dtype=jnp.float32)[:, None]            # (L, 1)
    div_term = jnp.exp(
        jnp.arange(0, d_model, 2, dtype=jnp.float32)
        * (-math.log(10000.0) / d_model))                                 # (D/2,)
    angles = position * div_term                                          # (L, D/2)
    pe = jnp.zeros((max_len, d_model), jnp.float32)
    pe = pe.at[:, 0::2].set(jnp.sin(angles))
    pe = pe.at[:, 1::2].set(jnp.cos(angles))
    return pe.astype(dtype)


def _add_pe_kernel(x_ref, pe_ref, o_ref):
    # Pure streaming add on lane-dense tiles; no temporaries, no lane copies.
    o_ref[...] = x_ref[...] + pe_ref[...]


def _round_up(v, m):
    return ((v + m - 1) // m) * m


def _round_down(v, m):
    return (v // m) * m


def _choose_width(n, max_width):
    """Largest multiple-of-128 divisor of n that is <= max_width (None if none)."""
    hi = _round_down(min(max_width, n), 128)
    for w in range(hi, 127, -128):
        if n % w == 0:
            return w
    return None


def sinusoidal_positional_encoding(
    x,
    pe_table,
    *,
    max_width=8192,
    vmem_block_budget_bytes=24 * 1024 * 1024,
    vmem_limit_bytes=48 * 1024 * 1024,
):
    """x: (S, B, D); pe_table: (max_len, D). Returns x + pe_table[:S][:, None, :]."""
    S, B, D = x.shape
    max_len, d_model = pe_table.shape
    if d_model != D:
        raise ValueError(f"d_model mismatch: x has {D}, pe_table has {d_model}")
    if S > max_len:
        raise ValueError(f"Sequence length {S} exceeds max_len {max_len}")

    # PyTorch type promotion: x + fp32 buffer promotes (e.g. fp16 x -> fp32 out).
    out_dtype = jnp.result_type(x.dtype, pe_table.dtype)
    itemsize = jnp.dtype(out_dtype).itemsize
    sublane = {4: 8, 2: 16, 1: 32}.get(itemsize, 8)

    x_c = x.astype(out_dtype)
    pe_rows = pe_table[:S].astype(out_dtype)                      # (S, D)
    # Broadcast across batch wrapper-side (tiny table): keeps the kernel a
    # plain full-lane add instead of materializing a jnp.tile per block.
    pe_slab = jnp.broadcast_to(pe_rows[:, None, :], (S, B, D))    # (S, B, D)

    n_elems = S * B * D
    w_total = _choose_width(n_elems, max_width)
    if w_total is None:
        # Fallback: natural (S, B*D) fold (trailing dim equals the full dim).
        n_rows, w_total = S, B * D
    else:
        n_rows = n_elems // w_total

    x2 = x_c.reshape(n_rows, w_total)
    pe2 = pe_slab.reshape(n_rows, w_total)

    # Width tile: full width when it fits, else 128-multiple chunks (2nd grid axis).
    if w_total <= max_width:
        wc = w_total
    else:
        wc = _round_down(max_width, 128)

    # Row tile from the VMEM budget: 3 blocks (x, pe, out), each double-buffered.
    bytes_per_row = wc * itemsize
    tr = _round_down(vmem_block_budget_bytes // (6 * bytes_per_row), sublane)
    tr = max(sublane, min(tr, _round_up(n_rows, sublane)))
    # Multi-MiB tensors: aim for >=8 evenly sized row steps (v7x dual TC);
    # small inputs stay single-step (no forced split on single-core v5e/v6e).
    if n_rows * w_total * itemsize >= (8 << 20):
        tr = max(sublane, min(tr, _round_up(pl.cdiv(n_rows, 8), sublane)))

    grid = (pl.cdiv(n_rows, tr), pl.cdiv(w_total, wc))

    out2 = pl.pallas_call(
        _add_pe_kernel,
        out_shape=jax.ShapeDtypeStruct((n_rows, w_total), out_dtype),
        grid=grid,
        in_specs=[
            pl.BlockSpec((tr, wc), lambda i, j: (i, j)),
            pl.BlockSpec((tr, wc), lambda i, j: (i, j)),
        ],
        out_specs=pl.BlockSpec((tr, wc), lambda i, j: (i, j)),
        compiler_params=pltpu.CompilerParams(
            dimension_semantics=("parallel", "parallel"),
            vmem_limit_bytes=vmem_limit_bytes,
        ),
        cost_estimate=pl.CostEstimate(
            flops=n_elems,
            transcendentals=0,
            bytes_accessed=3 * n_elems * itemsize,
        ),
    )(x2, pe2)

    return out2.reshape(S, B, D)


if __name__ == "__main__":
    # Module config consistent with the forward: d_model=32, max_len=1000.
    d_model = 32
    max_len = 1000
    batch = 2

    k1, k2, k3, k4 = jax.random.split(jax.random.PRNGKey(0), 4)
    pe_table = make_sinusoidal_table(max_len, d_model)

    # 1) Small case (single lane-dense block, W = 512).
    x = jax.random.normal(k1, (8, batch, d_model), dtype=jnp.float32)
    out = jax.block_until_ready(sinusoidal_positional_encoding(x, pe_table))
    ref = x + pe_table[:8][:, None, :]
    assert out.shape == x.shape
    assert jnp.allclose(out, ref, atol=1e-6), "mismatch vs reference (S=8)"

    # 2) Longer sequence: still a single wide block, exercises row padding.
    x2 = jax.random.normal(k2, (40, batch, d_model), dtype=jnp.float32)
    out2 = jax.block_until_ready(sinusoidal_positional_encoding(x2, pe_table))
    ref2 = x2 + pe_table[:40][:, None, :]
    assert jnp.allclose(out2, ref2, atol=1e-6), "mismatch vs reference (S=40)"

    # 3) Force a multi-step grid (tiny VMEM budget + narrow max_width).
    x3 = jax.random.normal(k3, (64, batch, d_model), dtype=jnp.float32)
    out3 = jax.block_until_ready(
        sinusoidal_positional_encoding(
            x3, pe_table, max_width=128, vmem_block_budget_bytes=4096))
    ref3 = x3 + pe_table[:64][:, None, :]
    assert jnp.allclose(out3, ref3, atol=1e-6), "mismatch vs reference (grid>1)"

    # 4) Width not foldable to a 128-multiple -> fallback (S, B*D) layout.
    pe_table20 = make_sinusoidal_table(max_len, 20)
    x4 = jax.random.normal(k4, (8, batch, 20), dtype=jnp.float32)
    out4 = jax.block_until_ready(sinusoidal_positional_encoding(x4, pe_table20))
    ref4 = x4 + pe_table20[:8][:, None, :]
    assert jnp.allclose(out4, ref4, atol=1e-6), "mismatch vs reference (fallback)"

    print("KERNEL_OK")
</pallas_src>

<mosaic_0001>
module attributes {stable_mosaic.version = 11 : i64} {
  func.func @_add_pe_kernel(%arg0: i32, %arg1: i32, %arg2: memref<8x512xf32, #tpu.memory_space<vmem>>, %arg3: memref<8x512xf32, #tpu.memory_space<vmem>>, %arg4: memref<8x512xf32, #tpu.memory_space<vmem>>) attributes {dimension_semantics = [#tpu.dimension_semantics<parallel>, #tpu.dimension_semantics<parallel>], iteration_bounds = array<i64: 1, 1>, scalar_prefetch = 0 : i64, scratch_operands = 0 : i64, tpu.core_type = #tpu.core_type<tc>, window_params = [{transform_indices = @transform_0, window_bounds = array<i64: 8, 512>}, {transform_indices = @transform_1, window_bounds = array<i64: 8, 512>}, {transform_indices = @transform_2, window_bounds = array<i64: 8, 512>}]} {
    %c0 = arith.constant 0 : index
    %c0_0 = arith.constant 0 : index
    %0 = vector.load %arg2[%c0, %c0_0] : memref<8x512xf32, #tpu.memory_space<vmem>>, vector<8x512xf32>
    %c0_1 = arith.constant 0 : index
    %c0_2 = arith.constant 0 : index
    %1 = vector.load %arg3[%c0_1, %c0_2] : memref<8x512xf32, #tpu.memory_space<vmem>>, vector<8x512xf32>
    %2 = arith.addf %0, %1 : vector<8x512xf32>
    %c0_3 = arith.constant 0 : index
    %c0_4 = arith.constant 0 : index
    %3 = vector.load %arg4[%c0_3, %c0_4] : memref<8x512xf32, #tpu.memory_space<vmem>>, vector<8x512xf32>
    tpu.vector_store %arg4[%c0_3, %c0_4], %2 {strides = array<i32>} : memref<8x512xf32, #tpu.memory_space<vmem>>, vector<8x512xf32>,
    return
  }
  func.func @transform_0(%arg0: i32, %arg1: i32) -> (i32, i32) {
    %c0_i32 = arith.constant 0 : i32
    return %arg0, %arg1 : i32, i32
  }
  func.func @transform_1(%arg0: i32, %arg1: i32) -> (i32, i32) {
    %c0_i32 = arith.constant 0 : i32
    return %arg0, %arg1 : i32, i32
  }
  func.func @transform_2(%arg0: i32, %arg1: i32) -> (i32, i32) {
    %c0_i32 = arith.constant 0 : i32
    return %arg0, %arg1 : i32, i32
  }
}

</mosaic_0001>

<bundles_post_ra>
// kernel: tpu_custom_call.1
= control target key start
LH: loop header
LB: loop body
LE: loop exit
PB: predicated region body
PF: predicated region fallthrough
CT: control target
= control target key end

     0   :  { %7 = vsyncpa [#allocation3], 0  ;;  %s223_s0 = inlined_call_operand.hbm [shape: f32[1,512], index: 0, kind: input, shape index: {}]   ;;  %s224_s1 = inlined_call_operand.hbm [shape: f32[1,512], index: 1, kind: input, shape index: {}]   ;;  %s225_s2 = inlined_call_operand.hbm [shape: f32[1,512], index: 2, kind: output, shape index: {}]  }
   0x1   :  { %8 = vsyncpa [#allocation6], 0 }
   0x2   :  { %9 = vsyncpa [#allocation4], 0 }
   0x3   :  { %14 = vsyncadd [#allocation3], 448  ;;  %s165_s9 = smov [#allocation2]  }
   0x4   :  { %s15_s10 = sshll.u32 %s165_s9, 4  ;;  %s16_s10 = int_to_ptr.vmem [resolvable:$true] %s15_s10 }
   0x5   :  { %s107_s11 = scalar_lea.vmem %s16_s10, 64  ;;  %s111_s12 = scalar_lea.vmem %s16_s10, 512 }
   0x6   :  { %p108_p0 = scmp.ne.s32.totalorder %s16_s10, %s107_s11  ;;  %p112_p1 = scmp.lt.s32.totalorder %s16_s10, %s16_s10 }
   0x7   :  { %p113_p2 = scmp.lt.s32.totalorder %s111_s12, %s107_s11 }
   0x9   :  { %p114_p3 = por %p113_p2, %p112_p1 }
   0xb   :  { %p115_p4 = pnand %p114_p3, %p108_p0 }
   0xd   :  { %118 = shalt.err (!%p115_p4)
}
   0xe   :  { %s166_s13 = smov 64   ;;  %s167_s14 = smov 4  }
   0xf   :  { %21 = dma.hbm_to_vmem [thread:$0]  %s223_s0, 64, %s16_s10, [#allocation3], %s166_s13, %s166_s13, %s167_s14  }
  0x10   :  { %26 = vsyncadd [#allocation6], 448  ;;  %s168_s17 = smov [#allocation5]  }
  0x11   :  { %s27_s18 = sshll.u32 %s168_s17, 4  ;;  %s28_s18 = int_to_ptr.vmem [resolvable:$true] %s27_s18 }
  0x12   :  { %s127_s19 = scalar_lea.vmem %s28_s18, 64  ;;  %s131_s20 = scalar_lea.vmem %s28_s18, 512 }
  0x13   :  { %p128_p5 = scmp.ne.s32.totalorder %s28_s18, %s127_s19  ;;  %p132_p6 = scmp.lt.s32.totalorder %s28_s18, %s28_s18 }
  0x14   :  { %p133_p7 = scmp.lt.s32.totalorder %s131_s20, %s127_s19 }
  0x16   :  { %p134_p8 = por %p133_p7, %p132_p6 }
  0x18   :  { %p135_p9 = pnand %p134_p8, %p128_p5 }
  0x1a   :  { %138 = shalt.err (!%p135_p9)
}
  0x1b   :  { %33 = dma.hbm_to_vmem [thread:$0]  %s224_s1, 64, %s28_s18, [#allocation6], %s166_s13, %s166_s13, %s167_s14  }
  0x1c   :  { %159 = dma.done.wait [#allocation3], 512  }
  0x1d   :  { %160 = vsyncadd [#allocation3], 4294966784 }
  0x1e   :  { %161 = dma.done.wait [#allocation6], 512  }
  0x1f   :  { %162 = vsyncadd [#allocation6], 4294966784  ;;  %v64_v0 = vlaneseq  ;;  %v40_v2 = vld [vmem:[#allocation2] sm:$0xf]  ;;  %v41_v4 = vld [vmem:[#allocation2 + $0x4] sm:$0xf] }
  0x20   :  { %v48_v3 = vld [vmem:[#allocation5] sm:$0xf]  ;;  %v49_v6 = vld [vmem:[#allocation5 + $0x4] sm:$0xf]  ;;  %v42_v7 = vld [vmem:[#allocation2 + $0x8] sm:$0xf] }
  0x21   :  { %vm197_vm0 = vcmp.lt.s32.totalorder %v64_v0, 512  ;;  %v56_v5 = vadd.f32 %v48_v3, %v40_v2  ;;  %v50_v8 = vld [vmem:[#allocation5 + $0x8] sm:$0xf]  ;;  %v57_v9 = vadd.f32 %v49_v6, %v41_v4  ;;  %v43_v11 = vld [vmem:[#allocation2 + $0xc] sm:$0xf] }
  0x22   :  { %v58_v10 = vadd.f32 %v50_v8, %v42_v7  ;;  %v51_v12 = vld [vmem:[#allocation5 + $0xc] sm:$0xf]  ;;  %v44_v13 = vld [vmem:[#allocation2 + $0x10] sm:$0xf]  ;;  %v45_v16 = vld [vmem:[#allocation2 + $0x14] sm:$0xf] }
  0x23   :  { %68 = vst.msk [vmem:[#allocation7] sm:$0xf] %vm197_vm0, %v56_v5  ;;  %v59_v14 = vadd.f32 %v51_v12, %v43_v11  ;;  %v52_v15 = vld [vmem:[#allocation5 + $0x10] sm:$0xf]  ;;  %v53_v17 = vld [vmem:[#allocation5 + $0x14] sm:$0xf] }
  0x24   :  { %69 = vst.msk [vmem:[#allocation7 + $0x4] sm:$0xf] %vm197_vm0, %v57_v9  ;;  %70 = vst.msk [vmem:[#allocation7 + $0x8] sm:$0xf] %vm197_vm0, %v58_v10  ;;  %v60_v18 = vadd.f32 %v52_v15, %v44_v13  ;;  %v61_v19 = vadd.f32 %v53_v17, %v45_v16  ;;  %v46_v20 = vld [vmem:[#allocation2 + $0x18] sm:$0xf] }
  0x25   :  { %v54_v21 = vld [vmem:[#allocation5 + $0x18] sm:$0xf]  ;;  %v47_v22 = vld [vmem:[#allocation2 + $0x1c] sm:$0xf]  ;;  %71 = vst.msk [vmem:[#allocation7 + $0xc] sm:$0xf] %vm197_vm0, %v59_v14 }
  0x26   :  { %v62_v23 = vadd.f32 %v54_v21, %v46_v20  ;;  %v55_v24 = vld [vmem:[#allocation5 + $0x1c] sm:$0xf]  ;;  %72 = vst.msk [vmem:[#allocation7 + $0x10] sm:$0xf] %vm197_vm0, %v60_v18  ;;  %73 = vst.msk [vmem:[#allocation7 + $0x14] sm:$0xf] %vm197_vm0, %v61_v19 }
  0x27   :  { %v63_v25 = vadd.f32 %v55_v24, %v47_v22 }
  0x28   :  { %74 = vst.msk [vmem:[#allocation7 + $0x18] sm:$0xf] %vm197_vm0, %v62_v23 }
  0x29   :  { %75 = vst.msk [vmem:[#allocation7 + $0x1c] sm:$0xf] %vm197_vm0, %v63_v25 }
  0x2a   :  { %80 = vsyncadd [#allocation4], 448  ;;  %s169_s0 = smov [#allocation7]  }
  0x2b   :  { %s81_s1 = sshll.u32 %s169_s0, 4  ;;  %s82_s1 = int_to_ptr.vmem [resolvable:$true] %s81_s1 }
  0x2c   :  { %s139_s23 = scalar_lea.vmem %s82_s1, 64  ;;  %s143_s24 = scalar_lea.vmem %s82_s1, 512 }
  0x2d   :  { %p140_p10 = scmp.ne.s32.totalorder %s82_s1, %s139_s23  ;;  %p144_p11 = scmp.lt.s32.totalorder %s82_s1, %s82_s1 }
  0x2e   :  { %p145_p12 = scmp.lt.s32.totalorder %s143_s24, %s139_s23 }
  0x30   :  { %p146_p13 = por %p145_p12, %p144_p11 }
  0x32   :  { %p147_p0 = pnand %p146_p13, %p140_p10 }
  0x34   :  { %150 = shalt.err (!%p147_p0)
}
  0x35   :  { %87 = dma.vmem_to_hbm [thread:$0]  %s82_s1, 64, %s225_s2, [#allocation4], %s166_s13, %s166_s13, %s167_s14  }
  0x36   :  { %163 = dma.done.wait [#allocation4], 512  }
  0x37   :  { %164 = vsyncadd [#allocation4], 4294966784 }
  0x38   :  { %91 = vsyncpa [#allocation3], 1 }
  0x39   :  { %92 = vsyncpa [#allocation6], 1 }
  0x3a   :  { %93 = vsyncpa [#allocation4], 1 }

</bundles_post_ra>
